<compile_context>
chip_gen: v7x
topology: tpu7x:2x2x1
jax: 0.10.0
libtpu: 0.0.40
codegen_flags: <defaults>
</compile_context>

<pallas_src>
import functools

import jax
import jax.numpy as jnp
from jax.experimental import pallas as pl
from jax.experimental.pallas import tpu as pltpu

LN_EPS = 1e-5          # PyTorch nn.LayerNorm default eps
OUT_PAD = 128          # lane-dense padded width for the 7-wide fc6 output
ALPHA_DIMS = [(28, 128), (128, 256), (256, 256), (256, 128), (128, 64), (64, 7)]


def _ln_relu_layer(h_bf16, w_ref, p_ref):
    """bf16 matmul (f32 accumulate) + bias + LayerNorm + ReLU; returns bf16."""
    z = jnp.dot(h_bf16, w_ref[...], preferred_element_type=jnp.float32)
    z = z + p_ref[0:1, :]                                   # bias row
    mu = jnp.mean(z, axis=-1, keepdims=True)
    # Single-pass variance E[z^2] - mu^2: one fewer elementwise pass than (z-mu)^2.
    var = jnp.maximum(jnp.mean(z * z, axis=-1, keepdims=True) - mu * mu, 0.0)
    inv = jax.lax.rsqrt(var + LN_EPS)                       # EUP slot (cheap)
    z = (z - mu) * inv * p_ref[1:2, :] + p_ref[2:3, :]      # gamma / beta rows
    return jnp.maximum(z, 0.0).astype(jnp.bfloat16)


def alpha_mlp_kernel(
    x_ref,
    w1_ref, p1_ref,
    w2_ref, p2_ref,
    w3_ref, p3_ref,
    w4_ref, p4_ref,
    w5_ref, p5_ref,
    w6_ref, b6_ref,
    o_ref,
):
    # Dropout layers are identity in eval/inference mode.
    h = x_ref[...].astype(jnp.bfloat16)
    h = _ln_relu_layer(h, w1_ref, p1_ref)
    h = _ln_relu_layer(h, w2_ref, p2_ref)
    h = _ln_relu_layer(h, w3_ref, p3_ref)
    h = _ln_relu_layer(h, w4_ref, p4_ref)
    h = _ln_relu_layer(h, w5_ref, p5_ref)
    # fc6 (no norm / activation); output columns 7..127 are zero-padded.
    out = jnp.dot(h, w6_ref[...], preferred_element_type=jnp.float32) + b6_ref[...]
    o_ref[...] = out.astype(o_ref.dtype)


def init_raw_params(key):
    """Deterministic synthetic f32 parameters matching Alpha's layer shapes.

    Layout: (w1, b1, g1, be1, ..., w5, b5, g5, be5, w6, b6); weights are
    stored (in_features, out_features) so the kernel computes h @ W + b.
    """
    params = []
    for li, (fan_in, fan_out) in enumerate(ALPHA_DIMS):
        key, kw, kb = jax.random.split(key, 3)
        bound = 1.0 / jnp.sqrt(float(fan_in))
        w = jax.random.uniform(kw, (fan_in, fan_out), jnp.float32, -bound, bound)
        b = jax.random.uniform(kb, (1, fan_out), jnp.float32, -bound, bound)
        params.extend([w, b])
        if li < 5:  # layers 1..5 have LayerNorm (gamma=1, beta=0)
            params.append(jnp.ones((1, fan_out), jnp.float32))
            params.append(jnp.zeros((1, fan_out), jnp.float32))
    return tuple(params)


def pack_params(raw):
    """Kernel-ready params: bf16 weights, one (3, D) [bias; gamma; beta] array
    per LN layer, and fc6 weight/bias zero-padded to a lane-dense 128 outputs."""
    packed = []
    idx = 0
    for _ in range(5):
        w, b, g, be = raw[idx:idx + 4]
        idx += 4
        packed.append(w.astype(jnp.bfloat16))
        packed.append(jnp.concatenate([b, g, be], axis=0).astype(jnp.float32))
    w6, b6 = raw[idx], raw[idx + 1]
    k_in, k_out = w6.shape
    w6p = jnp.zeros((k_in, OUT_PAD), jnp.float32).at[:, :k_out].set(w6)
    b6p = jnp.zeros((1, OUT_PAD), jnp.float32).at[:, :k_out].set(b6)
    packed.append(w6p.astype(jnp.bfloat16))
    packed.append(b6p)
    return tuple(packed)


@functools.partial(jax.jit, static_argnames=("block_b",))
def alpha_forward(x, packed_params, block_b=512):
    B, F = x.shape
    n_out = ALPHA_DIMS[-1][1]

    # Batch tile: multiple of 8 sublanes (or the full batch when it is ragged).
    if B % 8 == 0:
        tb = min(block_b, B)
    else:
        tb = B
    grid = (pl.cdiv(B, tb),)

    x_spec = pl.BlockSpec((tb, F), lambda i: (i, 0))
    out_spec = pl.BlockSpec((tb, OUT_PAD), lambda i: (i, 0))
    # Weights / LN params stay VMEM-resident across grid steps.
    param_specs = [pl.BlockSpec(p.shape, lambda i: (0, 0)) for p in packed_params]

    flops = 2 * B * sum(ki * ko for ki, ko in ALPHA_DIMS[:-1])
    flops += 2 * B * ALPHA_DIMS[-1][0] * OUT_PAD
    param_bytes = sum(p.size * p.dtype.itemsize for p in packed_params)
    cost = pl.CostEstimate(
        flops=int(flops),
        transcendentals=int(5 * B),  # one rsqrt per row per LN layer
        bytes_accessed=int(4 * B * F + 4 * B * OUT_PAD + param_bytes),
    )

    out_padded = pl.pallas_call(
        alpha_mlp_kernel,
        out_shape=jax.ShapeDtypeStruct((B, OUT_PAD), jnp.float32),
        grid_spec=pltpu.PrefetchScalarGridSpec(
            num_scalar_prefetch=0,
            grid=grid,
            in_specs=[x_spec] + param_specs,
            out_specs=out_spec,
        ),
        compiler_params=pltpu.CompilerParams(
            dimension_semantics=("parallel",),      # megacore sharding on v7x
            vmem_limit_bytes=32 * 1024 * 1024,      # safe on v5e/v6e/v7x
        ),
        cost_estimate=cost,
    )(x, *packed_params)

    return out_padded[:, :n_out]


def reference_forward(x, raw_params, *, bf16_matmul=False):
    """Pure-JAX reference mirroring the PyTorch forward (eval mode)."""
    idx = 0
    h = x
    for li in range(6):
        w, b = raw_params[idx], raw_params[idx + 1]
        idx += 2
        if bf16_matmul:
            z = jnp.dot(h.astype(jnp.bfloat16), w.astype(jnp.bfloat16),
                        preferred_element_type=jnp.float32) + b
        else:
            z = h @ w + b
        if li < 5:
            g, be = raw_params[idx], raw_params[idx + 1]
            idx += 2
            mu = jnp.mean(z, axis=-1, keepdims=True)
            var = jnp.mean((z - mu) ** 2, axis=-1, keepdims=True)
            z = (z - mu) / jnp.sqrt(var + LN_EPS)
            z = jnp.maximum(z * g + be, 0.0)
        h = z
    return h


if __name__ == "__main__":
    key = jax.random.PRNGKey(0)
    key, kx = jax.random.split(key)

    # Small batch; block_b=16 gives a 4-step pipelined batch grid for testing.
    B = 64
    x = jax.random.normal(kx, (B, 28), dtype=jnp.float32)

    raw_params = init_raw_params(key)
    packed_params = pack_params(raw_params)

    out = alpha_forward(x, packed_params, block_b=16)
    out = jax.block_until_ready(out)
    assert out.shape == (B, 7), out.shape

    # Tight check vs a reference mirroring the kernel's bf16-matmul math.
    ref_bf16 = reference_forward(x, raw_params, bf16_matmul=True)
    err_bf16 = float(jnp.max(jnp.abs(out - ref_bf16)))
    assert err_bf16 < 5e-3, err_bf16

    # Loose check vs the pure-f32 PyTorch-equivalent forward (bf16 rounding only).
    ref_f32 = reference_forward(x, raw_params, bf16_matmul=False)
    err_f32 = float(jnp.max(jnp.abs(out - ref_f32)))
    assert err_f32 < 1e-1, err_f32

    print("KERNEL_OK")
</pallas_src>

<mosaic_0001>
module attributes {stable_mosaic.version = 11 : i64} {
  func.func @alpha_mlp_kernel(%arg0: i32, %arg1: memref<16x28xf32, #tpu.memory_space<vmem>>, %arg2: memref<28x128xbf16, #tpu.memory_space<vmem>>, %arg3: memref<3x128xf32, #tpu.memory_space<vmem>>, %arg4: memref<128x256xbf16, #tpu.memory_space<vmem>>, %arg5: memref<3x256xf32, #tpu.memory_space<vmem>>, %arg6: memref<256x256xbf16, #tpu.memory_space<vmem>>, %arg7: memref<3x256xf32, #tpu.memory_space<vmem>>, %arg8: memref<256x128xbf16, #tpu.memory_space<vmem>>, %arg9: memref<3x128xf32, #tpu.memory_space<vmem>>, %arg10: memref<128x64xbf16, #tpu.memory_space<vmem>>, %arg11: memref<3x64xf32, #tpu.memory_space<vmem>>, %arg12: memref<64x128xbf16, #tpu.memory_space<vmem>>, %arg13: memref<1x128xf32, #tpu.memory_space<vmem>>, %arg14: memref<16x128xf32, #tpu.memory_space<vmem>>) attributes {dimension_semantics = [#tpu.dimension_semantics<parallel>], iteration_bounds = array<i64: 4>, scalar_prefetch = 0 : i64, scratch_operands = 0 : i64, tpu.core_type = #tpu.core_type<tc>, window_params = [{transform_indices = @transform_0, window_bounds = array<i64: 16, 28>}, {pipeline_mode = #tpu.pipeline_mode<synchronous>, transform_indices = @transform_1, window_bounds = array<i64: 28, 128>}, {pipeline_mode = #tpu.pipeline_mode<synchronous>, transform_indices = @transform_2, window_bounds = array<i64: 3, 128>}, {pipeline_mode = #tpu.pipeline_mode<synchronous>, transform_indices = @transform_3, window_bounds = array<i64: 128, 256>}, {pipeline_mode = #tpu.pipeline_mode<synchronous>, transform_indices = @transform_4, window_bounds = array<i64: 3, 256>}, {pipeline_mode = #tpu.pipeline_mode<synchronous>, transform_indices = @transform_5, window_bounds = array<i64: 256, 256>}, {pipeline_mode = #tpu.pipeline_mode<synchronous>, transform_indices = @transform_6, window_bounds = array<i64: 3, 256>}, {pipeline_mode = #tpu.pipeline_mode<synchronous>, transform_indices = @transform_7, window_bounds = array<i64: 256, 128>}, {pipeline_mode = #tpu.pipeline_mode<synchronous>, transform_indices = @transform_8, window_bounds = array<i64: 3, 128>}, {pipeline_mode = #tpu.pipeline_mode<synchronous>, transform_indices = @transform_9, window_bounds = array<i64: 128, 64>}, {pipeline_mode = #tpu.pipeline_mode<synchronous>, transform_indices = @transform_10, window_bounds = array<i64: 3, 64>}, {pipeline_mode = #tpu.pipeline_mode<synchronous>, transform_indices = @transform_11, window_bounds = array<i64: 64, 128>}, {pipeline_mode = #tpu.pipeline_mode<synchronous>, transform_indices = @transform_12, window_bounds = array<i64: 1, 128>}, {transform_indices = @transform_13, window_bounds = array<i64: 16, 128>}]} {
    %c0 = arith.constant 0 : index
    %c0_0 = arith.constant 0 : index
    %0 = vector.load %arg1[%c0, %c0_0] : memref<16x28xf32, #tpu.memory_space<vmem>>, vector<16x28xf32>
    %1 = arith.truncf %0 : vector<16x28xf32> to vector<16x28xbf16>
    %c0_1 = arith.constant 0 : index
    %c0_2 = arith.constant 0 : index
    %2 = vector.load %arg2[%c0_1, %c0_2] : memref<28x128xbf16, #tpu.memory_space<vmem>>, vector<28x128xbf16>
    %cst = arith.constant dense<0.000000e+00> : vector<16x128xf32>
    %3 = tpu.matmul %1, %2, %cst {dimension_numbers = #tpu.dot_dimension_numbers<[1], [0], [0], [1], [0, 0, 1, 1], [], []>} : vector<16x28xbf16>, vector<28x128xbf16>, vector<16x128xf32> -> vector<16x128xf32>
    %c0_3 = arith.constant 0 : index
    %c0_4 = arith.constant 0 : index
    %4 = vector.load %arg3[%c0_3, %c0_4] : memref<3x128xf32, #tpu.memory_space<vmem>>, vector<1x128xf32>
    %5 = vector.broadcast %4 : vector<1x128xf32> to vector<16x128xf32>
    %6 = arith.addf %3, %5 : vector<16x128xf32>
    %cst_5 = arith.constant dense<0.000000e+00> : vector<16xf32>
    %7 = vector.multi_reduction <add>, %6, %cst_5 [1] : vector<16x128xf32> to vector<16xf32>
    %8 = vector.shape_cast %7 : vector<16xf32> to vector<16x1xf32>
    %cst_6 = arith.constant 1.280000e+02 : f32
    %9 = vector.broadcast %cst_6 : f32 to vector<16x1xf32>
    %10 = arith.divf %8, %9 : vector<16x1xf32>
    %11 = arith.mulf %6, %6 : vector<16x128xf32>
    %cst_7 = arith.constant dense<0.000000e+00> : vector<16xf32>
    %12 = vector.multi_reduction <add>, %11, %cst_7 [1] : vector<16x128xf32> to vector<16xf32>
    %13 = vector.shape_cast %12 : vector<16xf32> to vector<16x1xf32>
    %cst_8 = arith.constant 1.280000e+02 : f32
    %14 = vector.broadcast %cst_8 : f32 to vector<16x1xf32>
    %15 = arith.divf %13, %14 : vector<16x1xf32>
    %16 = arith.mulf %10, %10 : vector<16x1xf32>
    %17 = arith.subf %15, %16 : vector<16x1xf32>
    %cst_9 = arith.constant 0.000000e+00 : f32
    %18 = vector.broadcast %cst_9 : f32 to vector<16x1xf32>
    %19 = arith.maximumf %17, %18 : vector<16x1xf32>
    %cst_10 = arith.constant 9.99999974E-6 : f32
    %20 = vector.broadcast %cst_10 : f32 to vector<16x1xf32>
    %21 = arith.addf %19, %20 : vector<16x1xf32>
    %22 = math.rsqrt %21 : vector<16x1xf32>
    %23 = vector.broadcast %10 : vector<16x1xf32> to vector<16x128xf32>
    %24 = arith.subf %6, %23 : vector<16x128xf32>
    %25 = vector.broadcast %22 : vector<16x1xf32> to vector<16x128xf32>
    %26 = arith.mulf %24, %25 : vector<16x128xf32>
    %c1 = arith.constant 1 : index
    %c0_11 = arith.constant 0 : index
    %27 = vector.load %arg3[%c1, %c0_11] : memref<3x128xf32, #tpu.memory_space<vmem>>, vector<1x128xf32>
    %28 = vector.broadcast %27 : vector<1x128xf32> to vector<16x128xf32>
    %29 = arith.mulf %26, %28 : vector<16x128xf32>
    %c2 = arith.constant 2 : index
    %c0_12 = arith.constant 0 : index
    %30 = vector.load %arg3[%c2, %c0_12] : memref<3x128xf32, #tpu.memory_space<vmem>>, vector<1x128xf32>
    %31 = vector.broadcast %30 : vector<1x128xf32> to vector<16x128xf32>
    %32 = arith.addf %29, %31 : vector<16x128xf32>
    %cst_13 = arith.constant 0.000000e+00 : f32
    %33 = vector.broadcast %cst_13 : f32 to vector<16x128xf32>
    %34 = arith.maximumf %32, %33 : vector<16x128xf32>
    %35 = arith.truncf %34 : vector<16x128xf32> to vector<16x128xbf16>
    %c0_14 = arith.constant 0 : index
    %c0_15 = arith.constant 0 : index
    %36 = vector.load %arg4[%c0_14, %c0_15] : memref<128x256xbf16, #tpu.memory_space<vmem>>, vector<128x256xbf16>
    %cst_16 = arith.constant dense<0.000000e+00> : vector<16x256xf32>
    %37 = tpu.matmul %35, %36, %cst_16 {dimension_numbers = #tpu.dot_dimension_numbers<[1], [0], [0], [1], [0, 0, 1, 1], [], []>} : vector<16x128xbf16>, vector<128x256xbf16>, vector<16x256xf32> -> vector<16x256xf32>
    %c0_17 = arith.constant 0 : index
    %c0_18 = arith.constant 0 : index
    %38 = vector.load %arg5[%c0_17, %c0_18] : memref<3x256xf32, #tpu.memory_space<vmem>>, vector<1x256xf32>
    %39 = vector.broadcast %38 : vector<1x256xf32> to vector<16x256xf32>
    %40 = arith.addf %37, %39 : vector<16x256xf32>
    %cst_19 = arith.constant dense<0.000000e+00> : vector<16xf32>
    %41 = vector.multi_reduction <add>, %40, %cst_19 [1] : vector<16x256xf32> to vector<16xf32>
    %42 = vector.shape_cast %41 : vector<16xf32> to vector<16x1xf32>
    %cst_20 = arith.constant 2.560000e+02 : f32
    %43 = vector.broadcast %cst_20 : f32 to vector<16x1xf32>
    %44 = arith.divf %42, %43 : vector<16x1xf32>
    %45 = arith.mulf %40, %40 : vector<16x256xf32>
    %cst_21 = arith.constant dense<0.000000e+00> : vector<16xf32>
    %46 = vector.multi_reduction <add>, %45, %cst_21 [1] : vector<16x256xf32> to vector<16xf32>
    %47 = vector.shape_cast %46 : vector<16xf32> to vector<16x1xf32>
    %cst_22 = arith.constant 2.560000e+02 : f32
    %48 = vector.broadcast %cst_22 : f32 to vector<16x1xf32>
    %49 = arith.divf %47, %48 : vector<16x1xf32>
    %50 = arith.mulf %44, %44 : vector<16x1xf32>
    %51 = arith.subf %49, %50 : vector<16x1xf32>
    %cst_23 = arith.constant 0.000000e+00 : f32
    %52 = vector.broadcast %cst_23 : f32 to vector<16x1xf32>
    %53 = arith.maximumf %51, %52 : vector<16x1xf32>
    %cst_24 = arith.constant 9.99999974E-6 : f32
    %54 = vector.broadcast %cst_24 : f32 to vector<16x1xf32>
    %55 = arith.addf %53, %54 : vector<16x1xf32>
    %56 = math.rsqrt %55 : vector<16x1xf32>
    %57 = vector.broadcast %44 : vector<16x1xf32> to vector<16x256xf32>
    %58 = arith.subf %40, %57 : vector<16x256xf32>
    %59 = vector.broadcast %56 : vector<16x1xf32> to vector<16x256xf32>
    %60 = arith.mulf %58, %59 : vector<16x256xf32>
    %c1_25 = arith.constant 1 : index
    %c0_26 = arith.constant 0 : index
    %61 = vector.load %arg5[%c1_25, %c0_26] : memref<3x256xf32, #tpu.memory_space<vmem>>, vector<1x256xf32>
    %62 = vector.broadcast %61 : vector<1x256xf32> to vector<16x256xf32>
    %63 = arith.mulf %60, %62 : vector<16x256xf32>
    %c2_27 = arith.constant 2 : index
    %c0_28 = arith.constant 0 : index
    %64 = vector.load %arg5[%c2_27, %c0_28] : memref<3x256xf32, #tpu.memory_space<vmem>>, vector<1x256xf32>
    %65 = vector.broadcast %64 : vector<1x256xf32> to vector<16x256xf32>
    %66 = arith.addf %63, %65 : vector<16x256xf32>
    %cst_29 = arith.constant 0.000000e+00 : f32
    %67 = vector.broadcast %cst_29 : f32 to vector<16x256xf32>
    %68 = arith.maximumf %66, %67 : vector<16x256xf32>
    %69 = arith.truncf %68 : vector<16x256xf32> to vector<16x256xbf16>
    %c0_30 = arith.constant 0 : index
    %c0_31 = arith.constant 0 : index
    %70 = vector.load %arg6[%c0_30, %c0_31] : memref<256x256xbf16, #tpu.memory_space<vmem>>, vector<256x256xbf16>
    %cst_32 = arith.constant dense<0.000000e+00> : vector<16x256xf32>
    %71 = tpu.matmul %69, %70, %cst_32 {dimension_numbers = #tpu.dot_dimension_numbers<[1], [0], [0], [1], [0, 0, 1, 1], [], []>} : vector<16x256xbf16>, vector<256x256xbf16>, vector<16x256xf32> -> vector<16x256xf32>
    %c0_33 = arith.constant 0 : index
    %c0_34 = arith.constant 0 : index
    %72 = vector.load %arg7[%c0_33, %c0_34] : memref<3x256xf32, #tpu.memory_space<vmem>>, vector<1x256xf32>
    %73 = vector.broadcast %72 : vector<1x256xf32> to vector<16x256xf32>
    %74 = arith.addf %71, %73 : vector<16x256xf32>
    %cst_35 = arith.constant dense<0.000000e+00> : vector<16xf32>
    %75 = vector.multi_reduction <add>, %74, %cst_35 [1] : vector<16x256xf32> to vector<16xf32>
    %76 = vector.shape_cast %75 : vector<16xf32> to vector<16x1xf32>
    %cst_36 = arith.constant 2.560000e+02 : f32
    %77 = vector.broadcast %cst_36 : f32 to vector<16x1xf32>
    %78 = arith.divf %76, %77 : vector<16x1xf32>
    %79 = arith.mulf %74, %74 : vector<16x256xf32>
    %cst_37 = arith.constant dense<0.000000e+00> : vector<16xf32>
    %80 = vector.multi_reduction <add>, %79, %cst_37 [1] : vector<16x256xf32> to vector<16xf32>
    %81 = vector.shape_cast %80 : vector<16xf32> to vector<16x1xf32>
    %cst_38 = arith.constant 2.560000e+02 : f32
    %82 = vector.broadcast %cst_38 : f32 to vector<16x1xf32>
    %83 = arith.divf %81, %82 : vector<16x1xf32>
    %84 = arith.mulf %78, %78 : vector<16x1xf32>
    %85 = arith.subf %83, %84 : vector<16x1xf32>
    %cst_39 = arith.constant 0.000000e+00 : f32
    %86 = vector.broadcast %cst_39 : f32 to vector<16x1xf32>
    %87 = arith.maximumf %85, %86 : vector<16x1xf32>
    %cst_40 = arith.constant 9.99999974E-6 : f32
    %88 = vector.broadcast %cst_40 : f32 to vector<16x1xf32>
    %89 = arith.addf %87, %88 : vector<16x1xf32>
    %90 = math.rsqrt %89 : vector<16x1xf32>
    %91 = vector.broadcast %78 : vector<16x1xf32> to vector<16x256xf32>
    %92 = arith.subf %74, %91 : vector<16x256xf32>
    %93 = vector.broadcast %90 : vector<16x1xf32> to vector<16x256xf32>
    %94 = arith.mulf %92, %93 : vector<16x256xf32>
    %c1_41 = arith.constant 1 : index
    %c0_42 = arith.constant 0 : index
    %95 = vector.load %arg7[%c1_41, %c0_42] : memref<3x256xf32, #tpu.memory_space<vmem>>, vector<1x256xf32>
    %96 = vector.broadcast %95 : vector<1x256xf32> to vector<16x256xf32>
    %97 = arith.mulf %94, %96 : vector<16x256xf32>
    %c2_43 = arith.constant 2 : index
    %c0_44 = arith.constant 0 : index
    %98 = vector.load %arg7[%c2_43, %c0_44] : memref<3x256xf32, #tpu.memory_space<vmem>>, vector<1x256xf32>
    %99 = vector.broadcast %98 : vector<1x256xf32> to vector<16x256xf32>
    %100 = arith.addf %97, %99 : vector<16x256xf32>
    %cst_45 = arith.constant 0.000000e+00 : f32
    %101 = vector.broadcast %cst_45 : f32 to vector<16x256xf32>
    %102 = arith.maximumf %100, %101 : vector<16x256xf32>
    %103 = arith.truncf %102 : vector<16x256xf32> to vector<16x256xbf16>
    %c0_46 = arith.constant 0 : index
    %c0_47 = arith.constant 0 : index
    %104 = vector.load %arg8[%c0_46, %c0_47] : memref<256x128xbf16, #tpu.memory_space<vmem>>, vector<256x128xbf16>
    %cst_48 = arith.constant dense<0.000000e+00> : vector<16x128xf32>
    %105 = tpu.matmul %103, %104, %cst_48 {dimension_numbers = #tpu.dot_dimension_numbers<[1], [0], [0], [1], [0, 0, 1, 1], [], []>} : vector<16x256xbf16>, vector<256x128xbf16>, vector<16x128xf32> -> vector<16x128xf32>
    %c0_49 = arith.constant 0 : index
    %c0_50 = arith.constant 0 : index
    %106 = vector.load %arg9[%c0_49, %c0_50] : memref<3x128xf32, #tpu.memory_space<vmem>>, vector<1x128xf32>
    %107 = vector.broadcast %106 : vector<1x128xf32> to vector<16x128xf32>
    %108 = arith.addf %105, %107 : vector<16x128xf32>
    %cst_51 = arith.constant dense<0.000000e+00> : vector<16xf32>
    %109 = vector.multi_reduction <add>, %108, %cst_51 [1] : vector<16x128xf32> to vector<16xf32>
    %110 = vector.shape_cast %109 : vector<16xf32> to vector<16x1xf32>
    %cst_52 = arith.constant 1.280000e+02 : f32
    %111 = vector.broadcast %cst_52 : f32 to vector<16x1xf32>
    %112 = arith.divf %110, %111 : vector<16x1xf32>
    %113 = arith.mulf %108, %108 : vector<16x128xf32>
    %cst_53 = arith.constant dense<0.000000e+00> : vector<16xf32>
    %114 = vector.multi_reduction <add>, %113, %cst_53 [1] : vector<16x128xf32> to vector<16xf32>
    %115 = vector.shape_cast %114 : vector<16xf32> to vector<16x1xf32>
    %cst_54 = arith.constant 1.280000e+02 : f32
    %116 = vector.broadcast %cst_54 : f32 to vector<16x1xf32>
    %117 = arith.divf %115, %116 : vector<16x1xf32>
    %118 = arith.mulf %112, %112 : vector<16x1xf32>
    %119 = arith.subf %117, %118 : vector<16x1xf32>
    %cst_55 = arith.constant 0.000000e+00 : f32
    %120 = vector.broadcast %cst_55 : f32 to vector<16x1xf32>
    %121 = arith.maximumf %119, %120 : vector<16x1xf32>
    %cst_56 = arith.constant 9.99999974E-6 : f32
    %122 = vector.broadcast %cst_56 : f32 to vector<16x1xf32>
    %123 = arith.addf %121, %122 : vector<16x1xf32>
    %124 = math.rsqrt %123 : vector<16x1xf32>
    %125 = vector.broadcast %112 : vector<16x1xf32> to vector<16x128xf32>
    %126 = arith.subf %108, %125 : vector<16x128xf32>
    %127 = vector.broadcast %124 : vector<16x1xf32> to vector<16x128xf32>
    %128 = arith.mulf %126, %127 : vector<16x128xf32>
    %c1_57 = arith.constant 1 : index
    %c0_58 = arith.constant 0 : index
    %129 = vector.load %arg9[%c1_57, %c0_58] : memref<3x128xf32, #tpu.memory_space<vmem>>, vector<1x128xf32>
    %130 = vector.broadcast %129 : vector<1x128xf32> to vector<16x128xf32>
    %131 = arith.mulf %128, %130 : vector<16x128xf32>
    %c2_59 = arith.constant 2 : index
    %c0_60 = arith.constant 0 : index
    %132 = vector.load %arg9[%c2_59, %c0_60] : memref<3x128xf32, #tpu.memory_space<vmem>>, vector<1x128xf32>
    %133 = vector.broadcast %132 : vector<1x128xf32> to vector<16x128xf32>
    %134 = arith.addf %131, %133 : vector<16x128xf32>
    %cst_61 = arith.constant 0.000000e+00 : f32
    %135 = vector.broadcast %cst_61 : f32 to vector<16x128xf32>
    %136 = arith.maximumf %134, %135 : vector<16x128xf32>
    %137 = arith.truncf %136 : vector<16x128xf32> to vector<16x128xbf16>
    %c0_62 = arith.constant 0 : index
    %c0_63 = arith.constant 0 : index
    %138 = vector.load %arg10[%c0_62, %c0_63] : memref<128x64xbf16, #tpu.memory_space<vmem>>, vector<128x64xbf16>
    %cst_64 = arith.constant dense<0.000000e+00> : vector<16x64xf32>
    %139 = tpu.matmul %137, %138, %cst_64 {dimension_numbers = #tpu.dot_dimension_numbers<[1], [0], [0], [1], [0, 0, 1, 1], [], []>} : vector<16x128xbf16>, vector<128x64xbf16>, vector<16x64xf32> -> vector<16x64xf32>
    %c0_65 = arith.constant 0 : index
    %c0_66 = arith.constant 0 : index
    %140 = vector.load %arg11[%c0_65, %c0_66] : memref<3x64xf32, #tpu.memory_space<vmem>>, vector<1x64xf32>
    %141 = vector.broadcast %140 : vector<1x64xf32> to vector<16x64xf32>
    %142 = arith.addf %139, %141 : vector<16x64xf32>
    %cst_67 = arith.constant dense<0.000000e+00> : vector<16xf32>
    %143 = vector.multi_reduction <add>, %142, %cst_67 [1] : vector<16x64xf32> to vector<16xf32>
    %144 = vector.shape_cast %143 : vector<16xf32> to vector<16x1xf32>
    %cst_68 = arith.constant 6.400000e+01 : f32
    %145 = vector.broadcast %cst_68 : f32 to vector<16x1xf32>
    %146 = arith.divf %144, %145 : vector<16x1xf32>
    %147 = arith.mulf %142, %142 : vector<16x64xf32>
    %cst_69 = arith.constant dense<0.000000e+00> : vector<16xf32>
    %148 = vector.multi_reduction <add>, %147, %cst_69 [1] : vector<16x64xf32> to vector<16xf32>
    %149 = vector.shape_cast %148 : vector<16xf32> to vector<16x1xf32>
    %cst_70 = arith.constant 6.400000e+01 : f32
    %150 = vector.broadcast %cst_70 : f32 to vector<16x1xf32>
    %151 = arith.divf %149, %150 : vector<16x1xf32>
    %152 = arith.mulf %146, %146 : vector<16x1xf32>
    %153 = arith.subf %151, %152 : vector<16x1xf32>
    %cst_71 = arith.constant 0.000000e+00 : f32
    %154 = vector.broadcast %cst_71 : f32 to vector<16x1xf32>
    %155 = arith.maximumf %153, %154 : vector<16x1xf32>
    %cst_72 = arith.constant 9.99999974E-6 : f32
    %156 = vector.broadcast %cst_72 : f32 to vector<16x1xf32>
    %157 = arith.addf %155, %156 : vector<16x1xf32>
    %158 = math.rsqrt %157 : vector<16x1xf32>
    %159 = vector.broadcast %146 : vector<16x1xf32> to vector<16x64xf32>
    %160 = arith.subf %142, %159 : vector<16x64xf32>
    %161 = vector.broadcast %158 : vector<16x1xf32> to vector<16x64xf32>
    %162 = arith.mulf %160, %161 : vector<16x64xf32>
    %c1_73 = arith.constant 1 : index
    %c0_74 = arith.constant 0 : index
    %163 = vector.load %arg11[%c1_73, %c0_74] : memref<3x64xf32, #tpu.memory_space<vmem>>, vector<1x64xf32>
    %164 = vector.broadcast %163 : vector<1x64xf32> to vector<16x64xf32>
    %165 = arith.mulf %162, %164 : vector<16x64xf32>
    %c2_75 = arith.constant 2 : index
    %c0_76 = arith.constant 0 : index
    %166 = vector.load %arg11[%c2_75, %c0_76] : memref<3x64xf32, #tpu.memory_space<vmem>>, vector<1x64xf32>
    %167 = vector.broadcast %166 : vector<1x64xf32> to vector<16x64xf32>
    %168 = arith.addf %165, %167 : vector<16x64xf32>
    %cst_77 = arith.constant 0.000000e+00 : f32
    %169 = vector.broadcast %cst_77 : f32 to vector<16x64xf32>
    %170 = arith.maximumf %168, %169 : vector<16x64xf32>
    %171 = arith.truncf %170 : vector<16x64xf32> to vector<16x64xbf16>
    %c0_78 = arith.constant 0 : index
    %c0_79 = arith.constant 0 : index
    %172 = vector.load %arg12[%c0_78, %c0_79] : memref<64x128xbf16, #tpu.memory_space<vmem>>, vector<64x128xbf16>
    %cst_80 = arith.constant dense<0.000000e+00> : vector<16x128xf32>
    %173 = tpu.matmul %171, %172, %cst_80 {dimension_numbers = #tpu.dot_dimension_numbers<[1], [0], [0], [1], [0, 0, 1, 1], [], []>} : vector<16x64xbf16>, vector<64x128xbf16>, vector<16x128xf32> -> vector<16x128xf32>
    %c0_81 = arith.constant 0 : index
    %c0_82 = arith.constant 0 : index
    %174 = vector.load %arg13[%c0_81, %c0_82] : memref<1x128xf32, #tpu.memory_space<vmem>>, vector<1x128xf32>
    %175 = vector.broadcast %174 : vector<1x128xf32> to vector<16x128xf32>
    %176 = arith.addf %173, %175 : vector<16x128xf32>
    %c0_83 = arith.constant 0 : index
    %c0_84 = arith.constant 0 : index
    %177 = vector.load %arg14[%c0_83, %c0_84] : memref<16x128xf32, #tpu.memory_space<vmem>>, vector<16x128xf32>
    tpu.vector_store %arg14[%c0_83, %c0_84], %176 {strides = array<i32>} : memref<16x128xf32, #tpu.memory_space<vmem>>, vector<16x128xf32>,
    return
  }
  func.func @transform_0(%arg0: i32) -> (i32, i32) {
    %c0_i32 = arith.constant 0 : i32
    %c0_i32_0 = arith.constant 0 : i32
    return %arg0, %c0_i32 : i32, i32
  }
  func.func @transform_1(%arg0: i32) -> (i32, i32) {
    %c0_i32 = arith.constant 0 : i32
    %c0_i32_0 = arith.constant 0 : i32
    %c0_i32_1 = arith.constant 0 : i32
    return %c0_i32, %c0_i32_0 : i32, i32
  }
  func.func @transform_2(%arg0: i32) -> (i32, i32) {
    %c0_i32 = arith.constant 0 : i32
    %c0_i32_0 = arith.constant 0 : i32
    %c0_i32_1 = arith.constant 0 : i32
    return %c0_i32, %c0_i32_0 : i32, i32
  }
  func.func @transform_3(%arg0: i32) -> (i32, i32) {
    %c0_i32 = arith.constant 0 : i32
    %c0_i32_0 = arith.constant 0 : i32
    %c0_i32_1 = arith.constant 0 : i32
    return %c0_i32, %c0_i32_0 : i32, i32
  }
  func.func @transform_4(%arg0: i32) -> (i32, i32) {
    %c0_i32 = arith.constant 0 : i32
    %c0_i32_0 = arith.constant 0 : i32
    %c0_i32_1 = arith.constant 0 : i32
    return %c0_i32, %c0_i32_0 : i32, i32
  }
  func.func @transform_5(%arg0: i32) -> (i32, i32) {
    %c0_i32 = arith.constant 0 : i32
    %c0_i32_0 = arith.constant 0 : i32
    %c0_i32_1 = arith.constant 0 : i32
    return %c0_i32, %c0_i32_0 : i32, i32
  }
  func.func @transform_6(%arg0: i32) -> (i32, i32) {
    %c0_i32 = arith.constant 0 : i32
    %c0_i32_0 = arith.constant 0 : i32
    %c0_i32_1 = arith.constant 0 : i32
    return %c0_i32, %c0_i32_0 : i32, i32
  }
  func.func @transform_7(%arg0: i32) -> (i32, i32) {
    %c0_i32 = arith.constant 0 : i32
    %c0_i32_0 = arith.constant 0 : i32
    %c0_i32_1 = arith.constant 0 : i32
    return %c0_i32, %c0_i32_0 : i32, i32
  }
  func.func @transform_8(%arg0: i32) -> (i32, i32) {
    %c0_i32 = arith.constant 0 : i32
    %c0_i32_0 = arith.constant 0 : i32
    %c0_i32_1 = arith.constant 0 : i32
    return %c0_i32, %c0_i32_0 : i32, i32
  }
  func.func @transform_9(%arg0: i32) -> (i32, i32) {
    %c0_i32 = arith.constant 0 : i32
    %c0_i32_0 = arith.constant 0 : i32
    %c0_i32_1 = arith.constant 0 : i32
    return %c0_i32, %c0_i32_0 : i32, i32
  }
  func.func @transform_10(%arg0: i32) -> (i32, i32) {
    %c0_i32 = arith.constant 0 : i32
    %c0_i32_0 = arith.constant 0 : i32
    %c0_i32_1 = arith.constant 0 : i32
    return %c0_i32, %c0_i32_0 : i32, i32
  }
  func.func @transform_11(%arg0: i32) -> (i32, i32) {
    %c0_i32 = arith.constant 0 : i32
    %c0_i32_0 = arith.constant 0 : i32
    %c0_i32_1 = arith.constant 0 : i32
    return %c0_i32, %c0_i32_0 : i32, i32
  }
  func.func @transform_12(%arg0: i32) -> (i32, i32) {
    %c0_i32 = arith.constant 0 : i32
    %c0_i32_0 = arith.constant 0 : i32
    %c0_i32_1 = arith.constant 0 : i32
    return %c0_i32, %c0_i32_0 : i32, i32
  }
  func.func @transform_13(%arg0: i32) -> (i32, i32) {
    %c0_i32 = arith.constant 0 : i32
    %c0_i32_0 = arith.constant 0 : i32
    return %arg0, %c0_i32 : i32, i32
  }
}

</mosaic_0001>

<bundles_post_ra>
// kernel: alpha_forward.1
= control target key start
LH: loop header
LB: loop body
LE: loop exit
PB: predicated region body
PF: predicated region fallthrough
CT: control target
= control target key end

     0   :  { %s2700_s0 = inlined_call_operand.vmem [shape: f32[64,28], index: 0, kind: input, shape index: {}]   ;;  %s2701_s1 = inlined_call_operand.hbm [shape: bf16[28,128], index: 1, kind: input, shape index: {}]   ;;  %s2702_s2 = inlined_call_operand.hbm [shape: f32[3,128], index: 2, kind: input, shape index: {}]   ;;  %s2703_s3 = inlined_call_operand.vmem [shape: bf16[128,256], index: 3, kind: input, shape index: {}]   ;;  %s2704_s4 = inlined_call_operand.vmem [shape: f32[3,256], index: 4, kind: input, shape index: {}]   ;;  %s2705_s5 = inlined_call_operand.hbm [shape: bf16[256,256], index: 5, kind: input, shape index: {}]   ;;  %s2706_s6 = inlined_call_operand.vmem [shape: f32[3,256], index: 6, kind: input, shape index: {}]   ;;  %s2707_s7 = inlined_call_operand.hbm [shape: bf16[256,128], index: 7, kind: input, shape index: {}]   ;;  %s2708_s8 = inlined_call_operand.vmem [shape: f32[3,128], index: 8, kind: input, shape index: {}]   ;;  %s2709_s9 = inlined_call_operand.vmem [shape: bf16[128,64], index: 9, kind: input, shape index: {}]   ;;  %s2710_s10 = inlined_call_operand.vmem [shape: f32[3,64], index: 10, kind: input, shape index: {}]   ;;  %s2711_s11 = inlined_call_operand.vmem [shape: bf16[64,128], index: 11, kind: input, shape index: {}]   ;;  %s2712_s12 = inlined_call_operand.vmem [shape: f32[1,128], index: 12, kind: input, shape index: {}]   ;;  %s2713_s13 = inlined_call_operand.vmem [shape: f32[64,128], index: 13, kind: output, shape index: {}]  }
   0x1   :  { %2720 = sst [smem:[#allocation12_spill]] %s2701_s1 }
   0x2   :  { %2721 = sst [smem:[#allocation13_spill]] %s2702_s2 }
   0x3   :  { %18 = vsyncpa [#allocation3], 0 }
   0x4   :  { %19 = vsyncpa [#allocation5], 0 }
   0x5   :  { %20 = vsyncpa [#allocation8], 0  ;;  %s2320_s25 = smov 0  }
   0x6 LB: > { %s2239_s26 = smov [#allocation4]   ;;  %s2717_s28 = sadd.s32 4294967295, %s2237_s25   ;;  %s2237_s25 = sphi %s2320_s25, %s26_s25  }
   0x7   : > { %s361_s27 = sshll.u32 %s2239_s26, 4  ;;  %p1739_p0 = scmp.ge.s32.totalorder %s2237_s25, 1  ;;  %s362_s27 = int_to_ptr.vmem [resolvable:$true] %s361_s27 }
   0x8   : > { %p335_p1 = scmp.lt.s32.totalorder %s2237_s25, 5  ;;  %p2330_p2 = scmp.eq.s32.totalorder %s2717_s28, 0 }
   0x9   : > { %s2240_s14 = smov [#allocation2]   ;;  %s2241_s17 = smov [#allocation6]  }
   0xa   : > { %s2722_s29 = scalar_select %p2330_p2, 1, 0 }
   0xb   : > { %p2334_p3 = pnand %p1739_p0, %p335_p1  ;;  %s347_s15 = sshll.u32 %s2240_s14, 4  ;;  %s2340_s15 = int_to_ptr.vmem [resolvable:$true] %s347_s15 }
   0xc   : > { %s377_s18 = sshll.u32 %s2241_s17, 4  ;;  %s2725_s2 = sld [smem:[#allocation13_spill]]  ;;  %s2348_s18 = int_to_ptr.vmem [resolvable:$true] %s377_s18 }
   0xd   : > { %s2723_s30 = scalar_select %p2334_p3, 1, 0 }
   0xe   : > { %p1945_p4 = pneg %p2334_p3 }
  0x10   : > { %p2344_p5 = pnand %p2330_p2, %p1945_p4 }
  0x12   : > { %s2107_s21 = scalar_lea.hbm %s2725_s2, 64  ;;  %p2358_p7 = pneg %p2344_p5 }
  0x13   : > { %p2108_p6 = scmp.ne.s32.totalorder %s2725_s2, %s2107_s21  ;;  %p2114_p10 = scmp.lt.u32.totalorder %s2107_s21, %s2725_s2 }
  0x15   : > { %p2110_p8 = pnand %p2358_p7, %p2108_p6 }
  0x17   : > { %p2111_p9 = pneg %p2110_p8 }
  0x19   : > { %p2116_p11 = pnand %p2114_p10, %p2111_p9 }
  0x1b   : > { %2119 = shalt.err (!%p2116_p11)
}
  0x1c   : > { %s2120_s17 = scalar_lea.vmem %s362_s27, 64  ;;  %p2128_p1 = scmp.lt.s32.totalorder %s362_s27, %s362_s27 }
  0x1d   : > { %p2121_p12 = scmp.ne.s32.totalorder %s362_s27, %s2120_s17  ;;  %p2129_p4 = scmp.lt.s32.totalorder %s2120_s17, %s2120_s17 }
  0x1f   : > { %p2123_p13 = pnand %p2121_p12, %p2358_p7  ;;  %p2130_p2 = por %p2129_p4, %p2128_p1 }
  0x21   : > { %p2124_p0 = pneg %p2123_p13 }
  0x23   : > { %p2131_p3 = pnand %p2130_p2, %p2124_p0 }
  0x25   : > { %2134 = shalt.err (!%p2131_p3)
}
  0x26   : > { %1951 = dma.hbm_to_vmem [thread:$0]  (!%p2344_p5), %s2725_s2, 64, %s362_s27, [#allocation5]  }
  0x27   : > { %s2727_s1 = sld [smem:[#allocation12_spill]] }
  0x2d   : > { %s2135_s23 = scalar_lea.hbm %s2727_s1, 256 }
  0x2e   : > { %p2136_p6 = scmp.ne.s32.totalorder %s2727_s1, %s2135_s23  ;;  %p2142_p2 = scmp.lt.u32.totalorder %s2135_s23, %s2727_s1 }
  0x30   : > { %p2138_p8 = pnand %p2136_p6, %p2358_p7 }
  0x32   : > { %p2139_p9 = pneg %p2138_p8 }
  0x34   : > { %p2144_p3 = pnand %p2142_p2, %p2139_p9 }
  0x36   : > { %2147 = shalt.err (!%p2144_p3)
}
  0x37   : > { %s2148_s27 = scalar_lea.vmem %s2340_s15, 256  ;;  %p2156_p13 = scmp.lt.s32.totalorder %s2340_s15, %s2340_s15 }
  0x38   : > { %p2149_p10 = scmp.ne.s32.totalorder %s2340_s15, %s2148_s27  ;;  %p2157_p0 = scmp.lt.s32.totalorder %s2148_s27, %s2148_s27 }
  0x3a   : > { %p2151_p11 = pnand %p2149_p10, %p2358_p7  ;;  %p2158_p1 = por %p2157_p0, %p2156_p13 }
  0x3c   : > { %p2152_p12 = pneg %p2151_p11 }
  0x3e   : > { %p2159_p4 = pnand %p2158_p1, %p2152_p12 }
  0x40   : > { %2162 = shalt.err (!%p2159_p4)
}
  0x41   : > { %s2718_s19 = smov 64   ;;  %s2719_s28 = smov 4  }
  0x42   : > { %1948 = dma.hbm_to_vmem [thread:$0]  (!%p2344_p5), %s2727_s1, 256, %s2340_s15, [#allocation3], %s2718_s19, %s2718_s19, %s2719_s28  }
  0x43   : > { %s2163_s26 = scalar_lea.hbm %s2705_s5, 4096 }
  0x44   : > { %p2164_p6 = scmp.ne.s32.totalorder %s2705_s5, %s2163_s26  ;;  %p2170_p2 = scmp.lt.u32.totalorder %s2163_s26, %s2705_s5 }
  0x46   : > { %p2166_p8 = pnand %p2164_p6, %p2358_p7 }
  0x48   : > { %p2167_p9 = pneg %p2166_p8 }
  0x4a   : > { %p2172_p3 = pnand %p2170_p2, %p2167_p9 }
  0x4c   : > { %2175 = shalt.err (!%p2172_p3)
}
  0x4d   : > { %s2176_s15 = scalar_lea.vmem %s2348_s18, 4096  ;;  %p2184_p13 = scmp.lt.s32.totalorder %s2348_s18, %s2348_s18 }
  0x4e   : > { %p2177_p10 = scmp.ne.s32.totalorder %s2348_s18, %s2176_s15  ;;  %p2185_p0 = scmp.lt.s32.totalorder %s2176_s15, %s2176_s15 }
  0x50   : > { %p2179_p11 = pnand %p2177_p10, %p2358_p7  ;;  %p2186_p1 = por %p2185_p0, %p2184_p13 }
  0x52   : > { %p2180_p12 = pneg %p2179_p11 }
  0x54   : > { %p2187_p4 = pnand %p2186_p1, %p2180_p12 }
  0x56   : > { %2190 = shalt.err (!%p2187_p4)
}
  0x57   : > { %s2244_s20 = smov 128   ;;  %s2245_s2 = smov 8  }
  0x58   : > { %1954 = dma.hbm_to_vmem [thread:$0]  (!%p2344_p5), %s2705_s5, 4096, %s2348_s18, [#allocation5], %s2244_s20, %s2244_s20, %s2245_s2  }
  0x59   : > { %s2246_s23 = smov [#allocation7]   ;;  %s2191_s27 = scalar_lea.hbm %s2707_s7, 2048 }
  0x5a   : > { %s393_s26 = sshll.u32 %s2246_s23, 4  ;;  %p2192_p6 = scmp.ne.s32.totalorder %s2707_s7, %s2191_s27  ;;  %s394_s26 = int_to_ptr.vmem [resolvable:$true] %s393_s26 }
  0x5b   : > { %p2198_p2 = scmp.lt.u32.totalorder %s2191_s27, %s2707_s7 }
  0x5c   : > { %p2194_p8 = pnand %p2192_p6, %p2358_p7 }
  0x5e   : > { %p2195_p9 = pneg %p2194_p8 }
  0x60   : > { %p2200_p3 = pnand %p2198_p2, %p2195_p9 }
  0x62   : > { %2203 = shalt.err (!%p2200_p3)
}
  0x63   : > { %s2204_s18 = scalar_lea.vmem %s394_s26, 2048  ;;  %p2212_p13 = scmp.lt.s32.totalorder %s394_s26, %s394_s26 }
  0x64   : > { %p2205_p10 = scmp.ne.s32.totalorder %s394_s26, %s2204_s18  ;;  %p2213_p0 = scmp.lt.s32.totalorder %s2204_s18, %s2204_s18 }
  0x66   : > { %p2207_p11 = pnand %p2205_p10, %p2358_p7  ;;  %p2214_p1 = por %p2213_p0, %p2212_p13 }
  0x68   : > { %p2208_p12 = pneg %p2207_p11 }
  0x6a   : > { %p2215_p4 = pnand %p2214_p1, %p2208_p12 }
  0x6c   : > { %2218 = shalt.err (!%p2215_p4)
}
  0x6d   : > { %s2728_s19 = smov 4   ;;  %s2729_s20 = smov 64  }
  0x6e   : > { %1957 = dma.hbm_to_vmem [thread:$0]  (!%p2344_p5), %s2707_s7, 2048, %s394_s26, [#allocation8], %s2729_s20, %s2729_s20, %s2728_s19  }
  0x6f   : > { %p2730_p6 = scmp.ne.s32.totalorder %s2723_s30, 0 }
  0x70   : > { %p2731_p7 = scmp.ne.s32.totalorder (!%p2730_p6), %s2722_s29, 0 }
  0x71   : > { %433 = sbr.rel (%p2730_p6) target bundleno = 2319 (0x90f), region = 72 }
  0x78   : > { %2224 = dma.done.wait (%p2731_p7), [#allocation3], 256  }
  0x79   : > { %2226 = vsyncadd (%p2731_p7), [#allocation3], 4294967040 }
  0x7a   : > { %2228 = dma.done.wait (%p2731_p7), [#allocation5], 4160  }
  0x7b   : > { %2230 = vsyncadd (%p2731_p7), [#allocation5], 4294963136 }
  0x7c   : > { %2232 = dma.done.wait (%p2731_p7), [#allocation8], 2048  }
  0x7d   : > { %2234 = vsyncadd (%p2731_p7), [#allocation8], 4294965248  ;;  %s2732_s30 = sadd.s32 4294967295, %s2237_s25   ;;  %v2247_v0 = vmov 0.0   ;;  %vm2248_vm0 = vmmov 0   ;;  %v1985_v1 = vld [vmem:[#allocation2] sm:$0xff]  }
  0x7e   : > { %s1750_s16 = sshll.u32 %s2732_s30, 1  ;;  %1889 = vmatprep.subr.bf16.mxu0 %v2247_v0  ;;  %1893 = vmatprep.mubr.msk.bf16.mxu0 %vm2248_vm0, %v2247_v0  ;;  %vm529_vm1 = vcmask 1045504   ;;  %v1986_v2 = vld [vmem:[#allocation2 + $0x8] sm:$0x3f]   ;;  %vm525_vm2 = vcmask 228352   ;;  %v2249_v27 = vmov 0  }
  0x7f   : > { %p490_p5 = scmp.lt.s32.totalorder %s1750_s16, 7  ;;  %1890 = vmatpush3.bf16.msra.mxu0 %v1985_v1  ;;  %v531_v5 = vsel %vm529_vm1, %v1986_v2, 0  ;;  %v1754_v7 = vld [vmem:[#allocation4] ss:$0 sm:$0xff]  ;;  %v1987_v16 = vld [vmem:[%s2703_s3 + $0x4] ss:$8 sps:$4 sm:$0xff]   ;;  %760 = vmatprep.mubr.bf16.mxu1 %v2249_v27 }
  0x80   : > { %1891 = vmatprep.subr.bf16.mxu0 %v2247_v0  ;;  %v1989_v17 = vld [vmem:[%s2703_s3] ss:$8 sps:$4 sm:$0xff]   ;;  %728 = vmatprep.subr.bf16.mxu1 %v1987_v16  ;;  %v1990_v18 = vld [vmem:[%s2703_s3 + $0x14] ss:$8 sps:$4 sm:$0xff]   ;;  %v1992_v19 = vld [vmem:[%s2703_s3 + $0x10] ss:$8 sps:$4 sm:$0xff]  }
  0x81   : > { %s2734_s16 = smov (!%p490_p5, %s1750_s16), 7  ;;  %729 = vmatpush1.bf16.msra.mxu1 %v1989_v17  ;;  %v1993_v20 = vld [vmem:[%s2703_s3 + $0x24] ss:$8 sps:$4 sm:$0xff]   ;;  %v1995_v21 = vld [vmem:[%s2703_s3 + $0x20] ss:$8 sps:$4 sm:$0xff]   ;;  %vm1504_vm3 = vcmask 523264  }
  0x82   : > { %s1751_s24 = sshll.u32 %s2734_s16, 3  ;;  %730 = vmatprep.subr.bf16.mxu1 %v1990_v18  ;;  %v1996_v22 = vld [vmem:[%s2703_s3 + $0x34] ss:$8 sps:$4 sm:$0xff]   ;;  %v1998_v23 = vld [vmem:[%s2703_s3 + $0x30] ss:$8 sps:$4 sm:$0xff]  }
  0x83   : > { %s493_s21 = scalar_lea.vmem %s2700_s0, %s1751_s24  ;;  %1892 = vmatpush3.bf16.msra.mxu0 %v531_v5  ;;  %v1999_v24 = vld [vmem:[%s2703_s3 + $0x44] ss:$8 sps:$4 sm:$0xff]   ;;  %v2001_v25 = vld [vmem:[%s2703_s3 + $0x40] ss:$8 sps:$4 sm:$0xff]   ;;  %v2002_v26 = vld [vmem:[%s2703_s3 + $0x54] ss:$8 sps:$4 sm:$0xff]   ;;  %s499_s17 = scalar_lea.vmem %s2713_s13, %s1751_s24 }
  0x84   : > { %v502_v3 = vld [vmem:[%s493_s21] sm:$0xff]  ;;  %v503_v4 = vld [vmem:[%s493_s21 + $0x8] sm:$0xff]  ;;  %v2004_v28 = vld [vmem:[%s2703_s3 + $0x50] ss:$8 sps:$4 sm:$0xff]  }
  0x85   : > { %v504_v6 = vpack.c.bf16 %v503_v4, %v502_v3  ;;  %731 = vmatpush1.bf16.msra.mxu1 %v1992_v19  ;;  %v2005_v29 = vld [vmem:[%s2703_s3 + $0x64] ss:$8 sps:$4 sm:$0xff]   ;;  %v2007_v30 = vld [vmem:[%s2703_s3 + $0x60] ss:$8 sps:$4 sm:$0xff]   ;;  %v2008_v31 = vld [vmem:[%s2703_s3 + $0x74] ss:$8 sps:$4 sm:$0xff]  }
  0x86   : > { %732 = vmatprep.subr.bf16.mxu1 %v1993_v20  ;;  %v2010_v32 = vld [vmem:[%s2703_s3 + $0x70] ss:$8 sps:$4 sm:$0xff]   ;;  %v2011_v1 = vld [vmem:[#allocation6] ss:$8 sps:$4 sm:$0xff]   ;;  %v2014_v4 = vld [vmem:[#allocation6 + $0x10] ss:$8 sps:$4 sm:$0xff]  }
  0x87   : > { %1894 = vmatmul.mubr.msk.bf16.vlgmr.msra.gmra.mrb[0].mxu0 %vm525_vm2, %v504_v6  ;;  %v1758_v51 = vld [vmem:[#allocation4 + $0x1] ss:$0 sm:$0xff]  ;;  %v1759_v56 = vld [vmem:[#allocation4 + $0x2] ss:$0 sm:$0xff]  ;;  %v2013_v2 = vld [vmem:[#allocation6 + $0x4] ss:$8 sps:$4 sm:$0xff]  }
  0x88   : > { %v2016_v3 = vld [vmem:[#allocation6 + $0x14] ss:$8 sps:$4 sm:$0xff]   ;;  %1054 = vmatprep.subr.bf16.mxu0 %v2013_v2  ;;  %v2019_v5 = vld [vmem:[#allocation6 + $0x24] ss:$8 sps:$4 sm:$0xff]   ;;  %v2017_v6 = vld [vmem:[#allocation6 + $0x20] ss:$8 sps:$4 sm:$0xff]  }
  0x89   : > { %733 = vmatpush1.bf16.msra.mxu1 %v1995_v21  ;;  %1055 = vmatpush1.bf16.msra.mxu0 %v2011_v1  ;;  %v636_v18 = vld [vmem:[%s2704_s4] ss:$4 sm:$0x3] }
  0x8a   : > { %734 = vmatprep.subr.bf16.mxu1 %v1996_v22  ;;  %1056 = vmatprep.subr.bf16.mxu0 %v2016_v3 }
  0x8d   : > { %735 = vmatpush1.bf16.msra.mxu1 %v1998_v23  ;;  %1057 = vmatpush1.bf16.msra.mxu0 %v2014_v4 }
  0x8e   : > { %736 = vmatprep.subr.bf16.mxu1 %v1999_v24  ;;  %1058 = vmatprep.subr.bf16.mxu0 %v2019_v5 }
  0x91   : > { %737 = vmatpush1.bf16.msra.mxu1 %v2001_v25  ;;  %1059 = vmatpush1.bf16.msra.mxu0 %v2017_v6 }
  0x92   : > { %738 = vmatprep.subr.bf16.mxu1 %v2002_v26 }
  0x95   : > { %739 = vmatpush1.bf16.msra.mxu1 %v2004_v28 }
  0x96   : > { %740 = vmatprep.subr.bf16.mxu1 %v2005_v29 }
  0x99   : > { %741 = vmatpush1.bf16.msra.mxu1 %v2007_v30 }
  0x9a   : > { %742 = vmatprep.subr.bf16.mxu1 %v2008_v31 }
  0x9d   : > { %743 = vmatpush1.bf16.msra.mxu1 %v2010_v32 }
 0x15a   : > { %v567_v8 = vpop.f32.mrb[0].mxu0 }
 0x15b   : > { %v2472_v9 = vadd.f32 %v1754_v7, %v567_v8  ;;  %v1895_v10 = vpop.f32.mrb[1].mxu0  ;;  %v2020_v8 = vld [vmem:[#allocation6 + $0x30] ss:$8 sps:$4 sm:$0xff]  }
 0x15c   : > { %v570_v11 = vpop.f32.mrb[2].mxu0  ;;  %v2023_v10 = vld [vmem:[#allocation6 + $0x40] ss:$8 sps:$4 sm:$0xff]  }
 0x15d   : > { %v2474_v12 = vadd.f32 %v1754_v7, %v570_v11  ;;  %574 = vadd.xlane.f32.xlu0 %v2472_v9  ;;  %v1896_v13 = vpop.f32.mrb[3].mxu0  ;;  %v581_v14 = vmul.f32 %v2472_v9, %v2472_v9  ;;  %v2022_v7 = vld [vmem:[#allocation6 + $0x34] ss:$8 sps:$4 sm:$0xff]  }
 0x15e   : > { %1060 = vmatprep.subr.bf16.mxu0 %v2022_v7  ;;  %v2028_v11 = vld [vmem:[#allocation6 + $0x54] ss:$8 sps:$4 sm:$0xff]   ;;  %v2031_v13 = vld [vmem:[#allocation6 + $0x64] ss:$8 sps:$4 sm:$0xff]  }
 0x15f   : > { %583 = vadd.xlane.f32.xlu1 %v581_v14  ;;  %v582_v15 = vmul.f32 %v2474_v12, %v2474_v12  ;;  %1061 = vmatpush1.bf16.msra.mxu0 %v2020_v8  ;;  %v2029_v14 = vld [vmem:[#allocation6 + $0x60] ss:$8 sps:$4 sm:$0xff]  }
 0x161   : > { %576 = vadd.xlane.f32.xlu0 %v2474_v12 }
 0x163   : > { %585 = vadd.xlane.f32.xlu1 %v582_v15  ;;  %v638_v15 = vlaneseq }
 0x165   : > { %v639_v16 = vshrl.u32 %v638_v15, 7 }
 0x167   : > { %v2532_v17 = vsub.s32 0, %v639_v16  ;;  %v2537_v19 = vsub.s32 1, %v639_v16 }
 0x169   : > { %v641_v20 = vrot.slane %v636_v18, %v2532_v17  ;;  %v645_v21 = vrot.slane %v636_v18, %v2537_v19 }
 0x1ea   : > { %v575_v33 = vpop.xlane.xlu0 %574 }
 0x1eb   : > { %v579_v34 = vmul.f32 0.0078125, %v575_v33 }
 0x1ec   : > { %v584_v35 = vpop.xlane.xlu1 %583 }
 0x1ed   : > { %v589_v36 = vmul.f32 %v579_v34, %v579_v34  ;;  %v587_v37 = vmul.f32 0.0078125, %v584_v35  ;;  %v599_v49 = vsub.f32 %v2472_v9, %v579_v34  ;;  %v2025_v9 = vld [vmem:[#allocation6 + $0x44] ss:$8 sps:$4 sm:$0xff]  }
 0x1ee   : > { %v577_v38 = vpop.xlane.xlu0 %576  ;;  %1062 = vmatprep.subr.bf16.mxu0 %v2025_v9  ;;  %v1776_v9 = vld [vmem:[%s2704_s4 + $0x1] ss:$4 sm:$0x3] }
 0x1ef   : > { %v591_v39 = vsub.f32 %v587_v37, %v589_v36  ;;  %v580_v40 = vmul.f32 0.0078125, %v577_v38  ;;  %1063 = vmatpush1.bf16.msra.mxu0 %v2023_v10  ;;  %v2034_v38 = vld [vmem:[#allocation6 + $0x74] ss:$8 sps:$4 sm:$0xff]   ;;  %v1777_v10 = vld [vmem:[%s2704_s4 + $0x2] ss:$4 sm:$0x3] }
 0x1f0   : > { %v586_v41 = vpop.xlane.xlu1 %585  ;;  %1064 = vmatprep.subr.bf16.mxu0 %v2028_v11  ;;  %v833_v16 = vrot.slane %v1777_v10, %v2532_v17  ;;  %v837_v18 = vrot.slane %v1777_v10, %v2537_v19  ;;  %v2072_v10 = vld [vmem:[#allocation7 + $0x30] sm:$0xff]  }
 0x1f1   : > { %v593_v42 = vmax.f32 %v591_v39, 0.0  ;;  %v590_v43 = vmul.f32 %v580_v40, %v580_v40  ;;  %v588_v44 = vmul.f32 0.0078125, %v586_v41  ;;  %v600_v53 = vsub.f32 %v2474_v12, %v580_v40  ;;  %v2026_v12 = vld [vmem:[#allocation6 + $0x50] ss:$8 sps:$4 sm:$0xff]   ;;  %v2037_v40 = vld [vmem:[#allocation6 + $0x84] ss:$8 sps:$4 sm:$0xff]  }
 0x1f2   : > { %v2032_v39 = vld [vmem:[#allocation6 + $0x70] ss:$8 sps:$4 sm:$0xff]   ;;  %v2035_v41 = vld [vmem:[#allocation6 + $0x80] ss:$8 sps:$4 sm:$0xff]  }
 0x1f3   : > { %v595_v45 = vadd.f32 1e-05, %v593_v42  ;;  %v592_v46 = vsub.f32 %v588_v44, %v590_v43  ;;  %1065 = vmatpush1.bf16.msra.mxu0 %v2026_v12  ;;  %v2040_v42 = vld [vmem:[#allocation6 + $0x94] ss:$8 sps:$4 sm:$0xff]   ;;  %v2038_v43 = vld [vmem:[#allocation6 + $0x90] ss:$8 sps:$4 sm:$0xff]  }
 0x1f4   : > { %1066 = vmatprep.subr.bf16.mxu0 %v2031_v13  ;;  %v2043_v44 = vld [vmem:[#allocation6 + $0xa4] ss:$8 sps:$4 sm:$0xff]   ;;  %v816_v13 = vrot.slane %v1776_v9, %v2532_v17 }
 0x1f5   : > { %2087 = vrsqrt.f32 %v595_v45  ;;  %v594_v47 = vmax.f32 %v592_v46, 0.0  ;;  %v2041_v45 = vld [vmem:[#allocation6 + $0xa0] ss:$8 sps:$4 sm:$0xff]   ;;  %v2044_v46 = vld [vmem:[#allocation6 + $0xb0] ss:$8 sps:$4 sm:$0xff]  }
 0x1f7   : > { %v596_v48 = vadd.f32 1e-05, %v594_v47  ;;  %1067 = vmatpush1.bf16.msra.mxu0 %v2029_v14  ;;  %v2046_v47 = vld [vmem:[#allocation6 + $0xb4] ss:$8 sps:$4 sm:$0xff]   ;;  %v820_v14 = vrot.slane %v1776_v9, %v2537_v19 }
 0x1f8   : > { %1068 = vmatprep.subr.bf16.mxu0 %v2034_v38  ;;  %v2071_v9 = vld [vmem:[#allocation7 + $0x70] sm:$0xff]  }
 0x1f9   : > { %2089 = vrsqrt.f32 %v596_v48  ;;  %v2049_v48 = vld [vmem:[#allocation6 + $0xc4] ss:$8 sps:$4 sm:$0xff]  }
 0x1fb   : > { %1069 = vmatpush1.bf16.msra.mxu0 %v2032_v39 }
 0x1fc   : > { %1070 = vmatprep.subr.bf16.mxu0 %v2037_v40 }
 0x1ff   : > { %v2088_v50 = vpop.eup %2087  ;;  %1071 = vmatpush1.bf16.msra.mxu0 %v2035_v41 }
 0x200   : > { %v601_v52 = vmul.f32 %v2088_v50, %v599_v49  ;;  %1072 = vmatprep.subr.bf16.mxu0 %v2040_v42  ;;  %v2047_v49 = vld [vmem:[#allocation6 + $0xc0] ss:$8 sps:$4 sm:$0xff]   ;;  %v2052_v50 = vld [vmem:[#allocation6 + $0xd4] ss:$8 sps:$4 sm:$0xff]  }
 0x202   : > { %v608_v54 = vmul.f32 %v1758_v51, %v601_v52  ;;  %v2055_v52 = vld [vmem:[#allocation6 + $0xe4] ss:$8 sps:$4 sm:$0xff]  }
 0x203   : > { %v2090_v55 = vpop.eup %2089  ;;  %1073 = vmatpush1.bf16.msra.mxu0 %v2038_v43 }
 0x204   : > { %v602_v57 = vmul.f32 %v2090_v55, %v600_v53  ;;  %v615_v59 = vadd.f32 %v1759_v56, %v608_v54  ;;  %1074 = vmatprep.subr.bf16.mxu0 %v2043_v44  ;;  %v2053_v53 = vld [vmem:[#allocation6 + $0xe0] ss:$8 sps:$4 sm:$0xff]   ;;  %v2058_v54 = vld [vmem:[#allocation6 + $0xf4] ss:$8 sps:$4 sm:$0xff]   ;;  %v2056_v55 = vld [vmem:[#allocation6 + $0xf0] ss:$8 sps:$4 sm:$0xff]  }
 0x206   : > { %v609_v58 = vmul.f32 %v1758_v51, %v602_v57  ;;  %v617_v61 = vmax.f32 %v615_v59, 0.0  ;;  %v2050_v51 = vld [vmem:[#allocation6 + $0xd0] ss:$8 sps:$4 sm:$0xff]  }
 0x207   : > { %1075 = vmatpush1.bf16.msra.mxu0 %v2041_v45 }
 0x208   : > { %v616_v60 = vadd.f32 %v1759_v56, %v609_v58  ;;  %1076 = vmatprep.subr.bf16.mxu0 %v2046_v47 }
 0x20a   : > { %v618_v62 = vmax.f32 %v616_v60, 0.0 }
 0x20b   : > { %1077 = vmatpush1.bf16.msra.mxu0 %v2044_v46 }
 0x20c   : > { %v619_v63 = vpack.c.bf16 %v618_v62, %v617_v61  ;;  %1078 = vmatprep.subr.bf16.mxu0 %v2049_v48 }
 0x20e   : > { %761 = vmatmul.mubr.bf16.vlgmr.msra.gmra.mrb[0].mxu1 %v619_v63 }
 0x20f   : > { %1079 = vmatpush1.bf16.msra.mxu0 %v2047_v49 }
 0x210   : > { %1080 = vmatprep.subr.bf16.mxu0 %v2052_v50 }
 0x213   : > { %1081 = vmatpush1.bf16.msra.mxu0 %v2050_v51 }
 0x214   : > { %1082 = vmatprep.subr.bf16.mxu0 %v2055_v52 }
 0x217   : > { %1083 = vmatpush1.bf16.msra.mxu0 %v2053_v53 }
 0x218   : > { %1084 = vmatprep.subr.bf16.mxu0 %v2058_v54 }
 0x21b   : > { %1085 = vmatpush1.bf16.msra.mxu0 %v2056_v55 }
 0x21c   : > { %1917 = vmatprep.subr.bf16.mxu0 %v2247_v0 }
 0x2e1   : > { %v762_v22 = vpop.f32.mrb[0].mxu1 }
 0x2e2   : > { %v2541_v23 = vadd.f32 %v762_v22, %v641_v20  ;;  %v764_v24 = vpop.f32.mrb[1].mxu1 }
 0x2e3   : > { %v2543_v25 = vadd.f32 %v764_v24, %v645_v21  ;;  %v766_v26 = vpop.f32.mrb[2].mxu1 }
 0x2e4   : > { %v2545_v27 = vadd.f32 %v766_v26, %v641_v20  ;;  %v768_v28 = vpop.f32.mrb[3].mxu1  ;;  %v780_v31 = vmul.f32 %v2541_v23, %v2541_v23 }
 0x2e5   : > { %v2547_v29 = vadd.f32 %v768_v28, %v645_v21  ;;  %v771_v30 = vadd.f32 %v2543_v25, %v2541_v23  ;;  %v781_v32 = vmul.f32 %v2543_v25, %v2543_v25 }
 0x2e6   : > { %v782_v34 = vmul.f32 %v2545_v27, %v2545_v27 }
 0x2e7   : > { %772 = vadd.xlane.f32.xlu0 %v771_v30  ;;  %v774_v33 = vadd.f32 %v2547_v29, %v2545_v27  ;;  %v783_v35 = vmul.f32 %v2547_v29, %v2547_v29  ;;  %v784_v36 = vadd.f32 %v781_v32, %v780_v31 }
 0x2e9   : > { %775 = vadd.xlane.f32.xlu1 %v774_v33  ;;  %v787_v37 = vadd.f32 %v783_v35, %v782_v34 }
 0x2eb   : > { %785 = vadd.xlane.f32.xlu0 %v784_v36 }
 0x2ed   : > { %788 = vadd.xlane.f32.xlu1 %v787_v37 }
 0x374   : > { %v773_v56 = vpop.xlane.xlu0 %772 }
 0x375   : > { %v778_v57 = vmul.f32 0.00390625, %v773_v56 }
 0x376   : > { %v776_v58 = vpop.xlane.xlu1 %775 }
 0x377   : > { %v779_v59 = vmul.f32 0.00390625, %v776_v58  ;;  %v792_v61 = vmul.f32 %v778_v57, %v778_v57  ;;  %v802_v11 = vsub.f32 %v2541_v23, %v778_v57  ;;  %v803_v12 = vsub.f32 %v2543_v25, %v778_v57 }
 0x378   : > { %v786_v60 = vpop.xlane.xlu0 %785 }
 0x379   : > { %v790_v62 = vmul.f32 0.00390625, %v786_v60  ;;  %v793_v2 = vmul.f32 %v779_v59, %v779_v59  ;;  %v804_v20 = vsub.f32 %v2545_v27, %v779_v59  ;;  %v805_v21 = vsub.f32 %v2547_v29, %v779_v59  ;;  %v882_v29 = vld [vmem:[%s2706_s6] ss:$4 sm:$0x3]  ;;  %v2059_v60 = vld [vmem:[#allocation7 + $0x40] sm:$0xff]  }
 0x37a   : > { %v789_v63 = vpop.xlane.xlu1 %788  ;;  %v887_v42 = vrot.slane %v882_v29, %v2532_v17  ;;  %v891_v43 = vrot.slane %v882_v29, %v2537_v19  ;;  %1853 = vmatprep.subr.bf16.mxu1 %v2059_v60  ;;  %v1812_v60 = vld [vmem:[%s2708_s8] ss:$0 sm:$0xff] }
 0x37b   : > { %v794_v1 = vsub.f32 %v790_v62, %v792_v61  ;;  %v791_v3 = vmul.f32 0.00390625, %v789_v63  ;;  %v2060_v61 = vld [vmem:[#allocation7] sm:$0xff]   ;;  %v2061_v62 = vld [vmem:[#allocation7 + $0x48] sm:$0xff]  }
 0x37c   : > { %1854 = vmatpush3.bf16.msra.mxu1 %v2060_v61  ;;  %v2062_v63 = vld [vmem:[#allocation7 + $0x8] sm:$0xff]  }
 0x37d   : > { %v796_v4 = vmax.f32 %v794_v1, 0.0  ;;  %v795_v5 = vsub.f32 %v791_v3, %v793_v2  ;;  %1855 = vmatprep.subr.bf16.mxu1 %v2061_v62  ;;  %v2063_v1 = vld [vmem:[#allocation7 + $0x50] sm:$0xff]   ;;  %v2065_v3 = vld [vmem:[#allocation7 + $0x58] sm:$0xff]  }
 0x37e   : > { %v2064_v2 = vld [vmem:[#allocation7 + $0x10] sm:$0xff]  }
 0x37f   : > { %v798_v6 = vadd.f32 1e-05, %v796_v4  ;;  %v797_v7 = vmax.f32 %v795_v5, 0.0  ;;  %v2066_v4 = vld [vmem:[#allocation7 + $0x18] sm:$0xff]   ;;  %v2067_v5 = vld [vmem:[#allocation7 + $0x60] sm:$0xff]  }
 0x380   : > { %1856 = vmatpush3.bf16.msra.mxu1 %v2062_v63 }
 0x381   : > { %2091 = vrsqrt.f32 %v798_v6  ;;  %v799_v8 = vadd.f32 1e-05, %v797_v7  ;;  %1857 = vmatprep.subr.bf16.mxu1 %v2063_v1  ;;  %v2068_v6 = vld [vmem:[#allocation7 + $0x20] sm:$0xff]   ;;  %v2069_v7 = vld [vmem:[#allocation7 + $0x68] sm:$0xff]  }
 0x383   : > { %2093 = vrsqrt.f32 %v799_v8  ;;  %v2070_v8 = vld [vmem:[#allocation7 + $0x28] sm:$0xff]  }
 0x384   : > { %1858 = vmatpush3.bf16.msra.mxu1 %v2064_v2 }
 0x385   : > { %1859 = vmatprep.subr.bf16.mxu1 %v2065_v3 }
 0x388   : > { %1860 = vmatpush3.bf16.msra.mxu1 %v2066_v4 }
 0x389   : > { %1861 = vmatprep.subr.bf16.mxu1 %v2067_v5 }
 0x38b   : > { %v2092_v15 = vpop.eup %2091 }
 0x38c   : > { %v807_v22 = vmul.f32 %v2092_v15, %v803_v12  ;;  %v806_v24 = vmul.f32 %v2092_v15, %v802_v11  ;;  %1862 = vmatpush3.bf16.msra.mxu1 %v2068_v6  ;;  %v2073_v11 = vld [vmem:[#allocation7 + $0x78] sm:$0xff]  }
 0x38d   : > { %v2094_v26 = vpop.eup %2093  ;;  %1863 = vmatprep.subr.bf16.mxu1 %v2069_v7  ;;  %v2074_v12 = vld [vmem:[#allocation7 + $0x38] sm:$0xff]   ;;  %v2075_v7 = vld [vmem:[%s2709_s9] sm:$0xff]  }
 0x38e   : > { %v809_v28 = vmul.f32 %v2094_v26, %v805_v21  ;;  %v824_v23 = vmul.f32 %v820_v14, %v807_v22  ;;  %v808_v30 = vmul.f32 %v2094_v26, %v804_v20  ;;  %v823_v25 = vmul.f32 %v816_v13, %v806_v24 }
 0x390   : > { %v826_v31 = vmul.f32 %v820_v14, %v809_v28  ;;  %v841_v32 = vadd.f32 %v837_v18, %v824_v23  ;;  %v825_v33 = vmul.f32 %v816_v13, %v808_v30  ;;  %v840_v34 = vadd.f32 %v833_v16, %v823_v25  ;;  %1864 = vmatpush3.bf16.msra.mxu1 %v2070_v8  ;;  %v2076_v8 = vld [vmem:[%s2709_s9 + $0x8] sm:$0xff]  }
 0x391   : > { %1865 = vmatprep.subr.bf16.mxu1 %v2071_v9  ;;  %v2077_v9 = vld [vmem:[%s2709_s9 + $0x10] sm:$0xff]  }
 0x392   : > { %v843_v35 = vadd.f32 %v837_v18, %v826_v31  ;;  %v842_v36 = vadd.f32 %v833_v16, %v825_v33  ;;  %v845_v37 = vmax.f32 %v841_v32, 0.0  ;;  %v844_v39 = vmax.f32 %v840_v34, 0.0  ;;  %v1810_v33 = vld [vmem:[%s2706_s6 + $0x1] ss:$4 sm:$0x3] }
 0x393   : > { %v1811_v34 = vld [vmem:[%s2706_s6 + $0x2] ss:$4 sm:$0x3] }
 0x394   : > { %v847_v38 = vmax.f32 %v843_v35, 0.0  ;;  %v846_v40 = vmax.f32 %v842_v36, 0.0  ;;  %1866 = vmatpush3.bf16.msra.mxu1 %v2072_v10  ;;  %v2078_v10 = vld [vmem:[%s2709_s9 + $0x18] sm:$0xff]  }
 0x395   : > { %1867 = vmatprep.subr.bf16.mxu1 %v2073_v11  ;;  %v2079_v11 = vld [vmem:[%s2709_s9 + $0x20] sm:$0xff]  }
 0x396   : > { %v849_v27 = vpack.c.bf16 %v847_v38, %v845_v37  ;;  %v848_v41 = vpack.c.bf16 %v846_v40, %v844_v39  ;;  %v1141_v37 = vrot.slane %v1810_v33, %v2532_v17  ;;  %v1145_v38 = vrot.slane %v1810_v33, %v2537_v19 }
 0x397   : > { %v1158_v40 = vrot.slane %v1811_v34, %v2532_v17 }
 0x398   : > { %1086 = vmatprep.mubr.bf16.mxu0 %v849_v27  ;;  %1868 = vmatpush3.bf16.msra.mxu1 %v2074_v12  ;;  %v1162_v27 = vrot.slane %v1811_v34, %v2537_v19  ;;  %v2080_v12 = vld [vmem:[%s2709_s9 + $0x28] sm:$0xff]  }
 0x399   : > { %1087 = vmatmul.mubr.bf16.vlgmr.msra.gmra.mrb[4].mxu0 %v848_v41  ;;  %1897 = vmatprep.subr.bf16.mxu1 %v2247_v0 }
 0x39a   : > { %1925 = vmatprep.mubr.msk.bf16.mxu0 %vm2248_vm0, %v2247_v0 }
 0x46c   : > { %v1088_v44 = vpop.f32.mrb[4].mxu0 }
 0x46d   : > { %v2583_v45 = vadd.f32 %v1088_v44, %v887_v42  ;;  %v1090_v46 = vpop.f32.mrb[5].mxu0 }
 0x46e   : > { %v2585_v47 = vadd.f32 %v1090_v46, %v891_v43  ;;  %v1092_v48 = vpop.f32.mrb[6].mxu0 }
 0x46f   : > { %v2587_v49 = vadd.f32 %v1092_v48, %v887_v42  ;;  %v1094_v50 = vpop.f32.mrb[7].mxu0  ;;  %v1105_v53 = vmul.f32 %v2583_v45, %v2583_v45 }
 0x470   : > { %v2589_v51 = vadd.f32 %v1094_v50, %v891_v43  ;;  %v1097_v52 = vadd.f32 %v2585_v47, %v2583_v45  ;;  %v1106_v54 = vmul.f32 %v2585_v47, %v2585_v47 }
 0x471   : > { %v1107_v56 = vmul.f32 %v2587_v49, %v2587_v49 }
 0x472   : > { %1098 = vadd.xlane.f32.xlu0 %v1097_v52  ;;  %v1100_v55 = vadd.f32 %v2589_v51, %v2587_v49  ;;  %v1108_v57 = vmul.f32 %v2589_v51, %v2589_v51  ;;  %v1109_v58 = vadd.f32 %v1106_v54, %v1105_v53 }
 0x474   : > { %1101 = vadd.xlane.f32.xlu1 %v1100_v55  ;;  %v1112_v59 = vadd.f32 %v1108_v57, %v1107_v56 }
 0x476   : > { %1110 = vadd.xlane.f32.xlu0 %v1109_v58 }
 0x478   : > { %1113 = vadd.xlane.f32.xlu1 %v1112_v59 }
 0x4ff   : > { %v1099_v13 = vpop.xlane.xlu0 %1098 }
 0x500   : > { %v1103_v14 = vmul.f32 0.00390625, %v1099_v13  ;;  %v2081_v13 = vld [vmem:[%s2709_s9 + $0x30] sm:$0xff]  }
 0x501   : > { %v1102_v15 = vpop.xlane.xlu1 %1101 }
 0x502   : > { %v1104_v16 = vmul.f32 0.00390625, %v1102_v15  ;;  %v1117_v20 = vmul.f32 %v1103_v14, %v1103_v14  ;;  %v1127_v35 = vsub.f32 %v2583_v45, %v1103_v14  ;;  %v1128_v36 = vsub.f32 %v2585_v47, %v1103_v14  ;;  %v2082_v14 = vld [vmem:[%s2709_s9 + $0x38] sm:$0xff]  }
 0x503   : > { %v1111_v18 = vpop.xlane.xlu0 %1110 }
 0x504   : > { %v1115_v21 = vmul.f32 0.00390625, %v1111_v18  ;;  %v1118_v26 = vmul.f32 %v1104_v16, %v1104_v16  ;;  %v1129_v41 = vsub.f32 %v2587_v49, %v1104_v16  ;;  %v1130_v29 = vsub.f32 %v2589_v51, %v1104_v16 }
 0x505   : > { %v1114_v22 = vpop.xlane.xlu1 %1113 }
 0x506   : > { %v1119_v24 = vsub.f32 %v1115_v21, %v1117_v20  ;;  %v1116_v28 = vmul.f32 0.00390625, %v1114_v22 }
 0x508   : > { %v1121_v23 = vmax.f32 %v1119_v24, 0.0  ;;  %v1120_v30 = vsub.f32 %v1116_v28, %v1118_v26 }
 0x50a   : > { %v1123_v25 = vadd.f32 1e-05, %v1121_v23  ;;  %v1122_v31 = vmax.f32 %v1120_v30, 0.0 }
 0x50c   : > { %2095 = vrsqrt.f32 %v1123_v25  ;;  %v1124_v32 = vadd.f32 1e-05, %v1122_v31 }
 0x50e   : > { %2097 = vrsqrt.f32 %v1124_v32 }
 0x516   : > { %v2096_v39 = vpop.eup %2095 }
 0x517   : > { %v1132_v42 = vmul.f32 %v2096_v39, %v1128_v36  ;;  %v1131_v43 = vmul.f32 %v2096_v39, %v1127_v35 }
 0x518   : > { %v2098_v44 = vpop.eup %2097 }
 0x519   : > { %v1134_v46 = vmul.f32 %v2098_v44, %v1130_v29  ;;  %v1149_v45 = vmul.f32 %v1145_v38, %v1132_v42  ;;  %v1133_v48 = vmul.f32 %v2098_v44, %v1129_v41  ;;  %v1148_v47 = vmul.f32 %v1141_v37, %v1131_v43 }
 0x51b   : > { %v1151_v50 = vmul.f32 %v1145_v38, %v1134_v46  ;;  %v1166_v52 = vadd.f32 %v1162_v27, %v1149_v45  ;;  %v1150_v53 = vmul.f32 %v1141_v37, %v1133_v48  ;;  %v1165_v54 = vadd.f32 %v1158_v40, %v1148_v47  ;;  %v1829_v37 = vld [vmem:[%s2708_s8 + $0x1] ss:$0 sm:$0xff]  ;;  %v1831_v47 = vld [vmem:[%s2710_s10] ss:$0 sm:$0xff] }
 0x51d   : > { %v1168_v55 = vadd.f32 %v1162_v27, %v1151_v50  ;;  %v1167_v56 = vadd.f32 %v1158_v40, %v1150_v53  ;;  %v1170_v17 = vmax.f32 %v1166_v52, 0.0  ;;  %v1169_v19 = vmax.f32 %v1165_v54, 0.0  ;;  %v1830_v27 = vld [vmem:[%s2708_s8 + $0x2] ss:$0 sm:$0xff] }
 0x51f   : > { %v1172_v57 = vmax.f32 %v1168_v55, 0.0  ;;  %v1171_v58 = vmax.f32 %v1167_v56, 0.0 }
 0x521   : > { %v1174_v49 = vpack.c.bf16 %v1172_v57, %v1170_v17  ;;  %v1173_v59 = vpack.c.bf16 %v1171_v58, %v1169_v19 }
 0x523   : > { %1340 = vmatprep.mubr.bf16.mxu1 %v1174_v49 }
 0x524   : > { %1341 = vmatmul.mubr.bf16.vlgmr.msra.gmra.mrb[4].mxu1 %v1173_v59 }
 0x525   : > { %1913 = vmatprep.mubr.msk.bf16.mxu1 %vm2248_vm0, %v2247_v0  ;;  %1898 = vmatpush3.bf16.msra.mxu1 %v2075_v7 }
 0x526   : > { %1899 = vmatprep.subr.bf16.mxu1 %v2247_v0 }
 0x529   : > { %1900 = vmatpush3.bf16.msra.mxu1 %v2076_v8 }
 0x52a   : > { %1901 = vmatprep.subr.bf16.mxu1 %v2247_v0 }
 0x52d   : > { %1902 = vmatpush3.bf16.msra.mxu1 %v2077_v9 }
 0x52e   : > { %1903 = vmatprep.subr.bf16.mxu1 %v2247_v0 }
 0x531   : > { %1904 = vmatpush3.bf16.msra.mxu1 %v2078_v10 }
 0x532   : > { %1905 = vmatprep.subr.bf16.mxu1 %v2247_v0 }
 0x535   : > { %1906 = vmatpush3.bf16.msra.mxu1 %v2079_v11 }
 0x536   : > { %1907 = vmatprep.subr.bf16.mxu1 %v2247_v0 }
 0x539   : > { %1908 = vmatpush3.bf16.msra.mxu1 %v2080_v12 }
 0x53a   : > { %1909 = vmatprep.subr.bf16.mxu1 %v2247_v0 }
 0x53d   : > { %1910 = vmatpush3.bf16.msra.mxu1 %v2081_v13 }
 0x53e   : > { %1911 = vmatprep.subr.bf16.mxu1 %v2247_v0 }
 0x541   : > { %1912 = vmatpush3.bf16.msra.mxu1 %v2082_v14 }
 0x5f7   : > { %v1869_v51 = vpop.f32.mrb[4].mxu1 }
 0x5f8   : > { %v1870_v61 = vpop.f32.mrb[5].mxu1 }
 0x5f9   : > { %v1871_v62 = vadd.f32 %v1870_v61, %v1869_v51  ;;  %v1872_v63 = vpop.f32.mrb[6].mxu1  ;;  %v2083_v51 = vld [vmem:[%s2711_s11] sm:$0xff]   ;;  %v2085_v61 = vld [vmem:[%s2711_s11 + $0x10] sm:$0xff]  }
 0x5fa   : > { %v1873_v1 = vpop.f32.mrb[7].mxu1  ;;  %1918 = vmatpush3.bf16.msra.mxu0 %v2083_v51 }
 0x5fb   : > { %v1343_v2 = vadd.f32 %v1871_v62, %v1812_v60  ;;  %v1874_v3 = vadd.f32 %v1873_v1, %v1872_v63  ;;  %1919 = vmatprep.subr.bf16.mxu0 %v2247_v0  ;;  %v2086_v62 = vld [vmem:[%s2711_s11 + $0x18] sm:$0xff]  }
 0x5fd   : > { %v1346_v4 = vadd.f32 %v1874_v3, %v1812_v60  ;;  %1349 = vadd.xlane.f32.xlu0 %v1343_v2  ;;  %v1355_v5 = vmul.f32 %v1343_v2, %v1343_v2  ;;  %v2084_v60 = vld [vmem:[%s2711_s11 + $0x8] sm:$0xff]  }
 0x5fe   : > { %1920 = vmatpush3.bf16.msra.mxu0 %v2084_v60 }
 0x5ff   : > { %1351 = vadd.xlane.f32.xlu1 %v1346_v4  ;;  %v1356_v6 = vmul.f32 %v1346_v4, %v1346_v4  ;;  %1921 = vmatprep.subr.bf16.mxu0 %v2247_v0 }
 0x601   : > { %1357 = vadd.xlane.f32.xlu0 %v1355_v5 }
 0x602   : > { %1922 = vmatpush3.bf16.msra.mxu0 %v2085_v61 }
 0x603   : > { %1359 = vadd.xlane.f32.xlu1 %v1356_v6  ;;  %1923 = vmatprep.subr.bf16.mxu0 %v2247_v0 }
 0x606   : > { %1924 = vmatpush3.bf16.msra.mxu0 %v2086_v62 }
 0x68a   : > { %v1350_v15 = vpop.xlane.xlu0 %1349 }
 0x68b   : > { %v1353_v16 = vmul.f32 0.0078125, %v1350_v15 }
 0x68c   : > { %v1352_v18 = vpop.xlane.xlu1 %1351 }
 0x68d   : > { %v1354_v20 = vmul.f32 0.0078125, %v1352_v18  ;;  %v1363_v22 = vmul.f32 %v1353_v16, %v1353_v16  ;;  %v1373_v35 = vsub.f32 %v1343_v2, %v1353_v16  ;;  %v1840_v18 = vld [vmem:[%s2710_s10 + $0x1] ss:$0 sm:$0xff] }
 0x68e   : > { %v1358_v21 = vpop.xlane.xlu0 %1357 }
 0x68f   : > { %v1361_v24 = vmul.f32 0.0078125, %v1358_v21  ;;  %v1364_v28 = vmul.f32 %v1354_v20, %v1354_v20  ;;  %v1374_v38 = vsub.f32 %v1346_v4, %v1354_v20 }
 0x690   : > { %v1360_v26 = vpop.xlane.xlu1 %1359 }
 0x691   : > { %v1365_v23 = vsub.f32 %v1361_v24, %v1363_v22  ;;  %v1362_v30 = vmul.f32 0.0078125, %v1360_v26  ;;  %v1841_v24 = vld [vmem:[%s2710_s10 + $0x2] ss:$0 sm:$0xff] }
 0x693   : > { %v1367_v25 = vmax.f32 %v1365_v23, 0.0  ;;  %v1366_v31 = vsub.f32 %v1362_v30, %v1364_v28 }
 0x695   : > { %v1369_v32 = vadd.f32 1e-05, %v1367_v25  ;;  %v1368_v33 = vmax.f32 %v1366_v31, 0.0 }
 0x697   : > { %2099 = vrsqrt.f32 %v1369_v32  ;;  %v1370_v34 = vadd.f32 1e-05, %v1368_v33 }
 0x699   : > { %2101 = vrsqrt.f32 %v1370_v34  ;;  %v1842_v34 = vld [vmem:[%s2712_s12] ss:$0 sm:$0xff] }
 0x6a1   : > { %v2100_v36 = vpop.eup %2099 }
 0x6a2   : > { %v1375_v39 = vmul.f32 %v2100_v36, %v1373_v35 }
 0x6a3   : > { %v2102_v40 = vpop.eup %2101 }
 0x6a4   : > { %v1376_v41 = vmul.f32 %v2102_v40, %v1374_v38  ;;  %v1382_v29 = vmul.f32 %v1829_v37, %v1375_v39 }
 0x6a6   : > { %v1383_v42 = vmul.f32 %v1829_v37, %v1376_v41  ;;  %v1389_v43 = vadd.f32 %v1830_v27, %v1382_v29 }
 0x6a8   : > { %v1390_v44 = vadd.f32 %v1830_v27, %v1383_v42  ;;  %v1391_v46 = vmax.f32 %v1389_v43, 0.0 }
 0x6aa   : > { %v1392_v45 = vmax.f32 %v1390_v44, 0.0 }
 0x6ac   : > { %v1393_v48 = vpack.c.bf16 %v1392_v45, %v1391_v46 }
 0x6ae   : > { %1914 = vmatmul.mubr.bf16.vlgmr.msra.gmra.mrb[8].mxu1 %v1393_v48 }
 0x781   : > { %v1497_v50 = vpop.f32.mrb[8].mxu1 }
 0x782   : > { %v1498_v52 = vadd.f32 %v1831_v47, %v1497_v50  ;;  %v1915_v53 = vpop.f32.mrb[9].mxu1 }
 0x783   : > { %v1500_v54 = vpop.f32.mrb[10].mxu1 }
 0x784   : > { %v1501_v55 = vadd.f32 %v1831_v47, %v1500_v54  ;;  %v1916_v56 = vpop.f32.mrb[11].mxu1  ;;  %v1505_v17 = vsel %vm1504_vm3, %v1498_v52, 0.0  ;;  %v1514_v57 = vmul.f32 %v1498_v52, %v1498_v52 }
 0x785   : > { %1506 = vadd.xlane.f32.xlu0 %v1505_v17 }
 0x786   : > { %v1508_v19 = vsel %vm1504_vm3, %v1501_v55, 0.0  ;;  %v1515_v58 = vmul.f32 %v1501_v55, %v1501_v55  ;;  %v1516_v49 = vsel %vm1504_vm3, %v1514_v57, 0.0 }
 0x787   : > { %1509 = vadd.xlane.f32.xlu1 %v1508_v19 }
 0x788   : > { %v1519_v59 = vsel %vm1504_vm3, %v1515_v58, 0.0 }
 0x789   : > { %1517 = vadd.xlane.f32.xlu0 %v1516_v49 }
 0x78b   : > { %1520 = vadd.xlane.f32.xlu1 %v1519_v59 }
 0x812   : > { %v1507_v63 = vpop.xlane.xlu0 %1506 }
 0x813   : > { %v1512_v1 = vmul.f32 0.015625, %v1507_v63 }
 0x814   : > { %v1510_v2 = vpop.xlane.xlu1 %1509 }
 0x815   : > { %v1513_v3 = vmul.f32 0.015625, %v1510_v2  ;;  %v1524_v5 = vmul.f32 %v1512_v1, %v1512_v1  ;;  %v1534_v0 = vsub.f32 %v1498_v52, %v1512_v1 }
 0x816   : > { %v1518_v4 = vpop.xlane.xlu0 %1517 }
 0x817   : > { %v1522_v6 = vmul.f32 0.015625, %v1518_v4  ;;  %v1525_v8 = vmul.f32 %v1513_v3, %v1513_v3  ;;  %v1535_v20 = vsub.f32 %v1501_v55, %v1513_v3 }
 0x818   : > { %v1521_v7 = vpop.xlane.xlu1 %1520 }
 0x819   : > { %v1526_v9 = vsub.f32 %v1522_v6, %v1524_v5  ;;  %v1523_v10 = vmul.f32 0.015625, %v1521_v7 }
 0x81b   : > { %v1528_v11 = vmax.f32 %v1526_v9, 0.0  ;;  %v1527_v12 = vsub.f32 %v1523_v10, %v1525_v8 }
 0x81d   : > { %v1530_v13 = vadd.f32 1e-05, %v1528_v11  ;;  %v1529_v14 = vmax.f32 %v1527_v12, 0.0 }
 0x81f   : > { %2103 = vrsqrt.f32 %v1530_v13  ;;  %v1531_v15 = vadd.f32 1e-05, %v1529_v14 }
 0x821   : > { %2105 = vrsqrt.f32 %v1531_v15 }
 0x829   : > { %v2104_v16 = vpop.eup %2103 }
 0x82a   : > { %v1536_v21 = vmul.f32 %v2104_v16, %v1534_v0 }
 0x82b   : > { %v2106_v22 = vpop.eup %2105 }
 0x82c   : > { %v1543_v26 = vmul.f32 %v1840_v18, %v1536_v21  ;;  %v1537_v28 = vmul.f32 %v2106_v22, %v1535_v20 }
 0x82e   : > { %v1544_v23 = vmul.f32 %v1840_v18, %v1537_v28  ;;  %v1550_v30 = vadd.f32 %v1841_v24, %v1543_v26 }
 0x830   : > { %v1551_v25 = vadd.f32 %v1841_v24, %v1544_v23  ;;  %v1552_v31 = vmax.f32 %v1550_v30, 0.0 }
 0x832   : > { %v1553_v32 = vmax.f32 %v1551_v25, 0.0 }
 0x834   : > { %v1554_v33 = vpack.c.bf16 %v1553_v32, %v1552_v31 }
 0x836   : > { %1926 = vmatmul.mubr.msk.bf16.vlgmr.msra.gmra.mrb[8].mxu0 %vm1504_vm3, %v1554_v33 }
 0x909   : > { %v1631_v35 = vpop.f32.mrb[8].mxu0 }
 0x90a   : > { %v1632_v36 = vadd.f32 %v1842_v34, %v1631_v35  ;;  %v1927_v37 = vpop.f32.mrb[9].mxu0 }
 0x90b   : > { %v1634_v38 = vpop.f32.mrb[10].mxu0 }
 0x90c   : > { %1638 = vst [vmem:[%s499_s17] sm:$0xff] %v1632_v36  ;;  %v1635_v39 = vadd.f32 %v1842_v34, %v1634_v38  ;;  %v1928_v40 = vpop.f32.mrb[11].mxu0 }
 0x90e   : > { %1639 = vst [vmem:[%s499_s17 + $0x8] sm:$0xff] %v1635_v39 }
 0x90f PF: > { %s26_s25 = sadd.s32 1, %s2237_s25  }
 0x910   : > { %p23_p8 = scmp.ge.s32.totalorder %s26_s25, 6  }
 0x912   :  { %25 = sbr.rel (!%p23_p8) target bundleno = 6 (0x6), region = 123 }
 0x919   :  { %1662 = vsyncpa [#allocation3], 1 }
 0x91a   :  { %1664 = vsyncpa [#allocation3 + $0x1], 1 }
 0x91b   :  { %1665 = vsyncpa [#allocation5], 1 }
 0x91c   :  { %1666 = vsyncpa [#allocation8], 1 }

</bundles_post_ra>
